<compile_context>
chip_gen: v7x
topology: tpu7x:2x2x1
jax: 0.10.0
libtpu: 0.0.40
codegen_flags: <defaults>
</compile_context>

<pallas_src>
import functools

import jax
import jax.numpy as jnp
from jax.experimental import pallas as pl
from jax.experimental.pallas import tpu as pltpu


# ----------------------------- Pallas kernel -------------------------------

def basic_block1d_kernel(
    x_ref,            # (1, Cin, L)      input, PyTorch NCL layout
    w1d_ref,          # (2*Cout, 3*Cin)  conv1 taps (rows 0..Cout-1) + downsample 1x1 (rows Cout..)
    s1_ref, t1_ref,   # (Cout, 1)        folded bn1 scale / shift (incl. conv bias)
    w2_ref,           # (Cout, 3*Cout)   conv2 taps, flattened
    s2_ref, t2_ref,   # (Cout, 1)
    fc1w_ref,         # (Cr, Cout)       SE fc1
    fc1b_ref,         # (Cr, 1)
    fc2w_ref,         # (Cout, Cr)       SE fc2
    fc2b_ref,         # (Cout, 1)
    sd_ref, td_ref,   # (Cout, 1)        folded downsample BN scale / shift
    o_ref,            # (1, Cout, L)     output, PyTorch NCL layout (lane-dense L)
):
    x = x_ref[0]                     # (Cin, L)
    L = x.shape[1]
    Cout = o_ref.shape[1]

    # Boundary masks for the 'same'-padded k=3 conv — built ONCE, reused by both convs.
    lane = jax.lax.broadcasted_iota(jnp.int32, (1, L), 1)
    m_left = lane >= 1               # valid lanes of the x[l-1] copy
    m_right = lane < L - 1           # valid lanes of the x[l+1] copy

    def taps(inp):
        # concat([x[l-1], x[l], x[l+1]]) along channels -> one K-fused MXU matmul.
        # Shifts are lane rolls (XLU slot, off the VPU critical path).
        left = jnp.where(m_left, pltpu.roll(inp, shift=1, axis=1), 0.0)       # inp[:, l-1]
        right = jnp.where(m_right, pltpu.roll(inp, shift=L - 1, axis=1), 0.0)  # inp[:, l+1]
        return jnp.concatenate([left, inp, right], axis=0)

    # conv1 (k=3) and downsample 1x1 conv fused into a single (2*Cout, 3*Cin) x (3*Cin, L) matmul.
    h = jnp.dot(w1d_ref[...], taps(x), preferred_element_type=jnp.float32)    # (2*Cout, L)
    out = h[:Cout]                                                            # conv1 pre-BN
    ident = h[Cout:] * sd_ref[...] + td_ref[...]                              # downsample + folded BN

    # bn1 (folded) + relu
    out = jnp.maximum(out * s1_ref[...] + t1_ref[...], 0.0)

    # conv2 -> bn2 (folded)
    out = jnp.dot(w2_ref[...], taps(out), preferred_element_type=jnp.float32)  # (Cout, L)
    out = out * s2_ref[...] + t2_ref[...]

    # SE block: global average pool over L (cross-lane reduce), two tiny FCs, sigmoid gate.
    m = jnp.mean(out, axis=1, keepdims=True)                                  # (Cout, 1)
    hse = jnp.dot(fc1w_ref[...], m, preferred_element_type=jnp.float32) + fc1b_ref[...]
    hse = jnp.maximum(hse, 0.0)
    g = jnp.dot(fc2w_ref[...], hse, preferred_element_type=jnp.float32) + fc2b_ref[...]
    g = 1.0 / (1.0 + jnp.exp(-g))     # exact sigmoid (approx EUP recip would cost ~1e-3 abs err)
    out = out * g                                                             # broadcast over L

    # residual add + relu; store is lane-dense (L=128 on lanes), no wrapper transpose needed.
    o_ref[...] = jnp.maximum(out + ident, 0.0)[None]


def basic_block1d_pallas(x_ncl, kp):
    """x_ncl: (B, Cin, L) float32, PyTorch layout. Returns (B, Cout, L)."""
    B, Cin, L = x_ncl.shape
    Cout = kp["w1d"].shape[0] // 2
    Cr = kp["fc1w"].shape[0]

    const = lambda shape: pl.BlockSpec(shape, lambda b: (0,) * len(shape))

    return pl.pallas_call(
        basic_block1d_kernel,
        out_shape=jax.ShapeDtypeStruct((B, Cout, L), jnp.float32),
        grid_spec=pltpu.PrefetchScalarGridSpec(
            num_scalar_prefetch=0,
            # grid=(B,) "parallel": 2 steps feed both v7x TCs; on single-TC v5e/v6e the
            # extra step costs ~0.35us (whole problem fits VMEM, blocks are full C x L).
            grid=(B,),
            in_specs=[
                pl.BlockSpec((1, Cin, L), lambda b: (b, 0, 0)),
                const((2 * Cout, 3 * Cin)),
                const((Cout, 1)), const((Cout, 1)),
                const((Cout, 3 * Cout)),
                const((Cout, 1)), const((Cout, 1)),
                const((Cr, Cout)), const((Cr, 1)),
                const((Cout, Cr)), const((Cout, 1)),
                const((Cout, 1)), const((Cout, 1)),
            ],
            out_specs=pl.BlockSpec((1, Cout, L), lambda b: (b, 0, 0)),
        ),
        compiler_params=pltpu.CompilerParams(dimension_semantics=("parallel",)),
    )(
        x_ncl,
        kp["w1d"], kp["s1"], kp["t1"],
        kp["w2"], kp["s2"], kp["t2"],
        kp["fc1w"], kp["fc1b"], kp["fc2w"], kp["fc2b"],
        kp["sd"], kp["td"],
    )


# --------------------------- parameters & reference -------------------------

def make_params(key, Cin, Cout, reduction=16, eps=1e-5):
    Cr = Cout // reduction
    ks = jax.random.split(key, 16)
    u = lambda k, shape, lo, hi: jax.random.uniform(k, shape, jnp.float32, lo, hi)
    p = dict(
        w1=0.1 * jax.random.normal(ks[0], (Cout, Cin, 3), jnp.float32),
        b1=0.1 * jax.random.normal(ks[1], (Cout,), jnp.float32),
        g1=u(ks[2], (Cout,), 0.5, 1.5), be1=0.1 * jax.random.normal(ks[3], (Cout,)),
        rm1=0.1 * jax.random.normal(ks[4], (Cout,)), rv1=u(ks[4], (Cout,), 0.5, 1.5),
        w2=0.1 * jax.random.normal(ks[5], (Cout, Cout, 3), jnp.float32),
        b2=0.1 * jax.random.normal(ks[6], (Cout,), jnp.float32),
        g2=u(ks[7], (Cout,), 0.5, 1.5), be2=0.1 * jax.random.normal(ks[8], (Cout,)),
        rm2=0.1 * jax.random.normal(ks[9], (Cout,)), rv2=u(ks[9], (Cout,), 0.5, 1.5),
        fc1_w=0.2 * jax.random.normal(ks[10], (Cr, Cout), jnp.float32),
        fc1_b=0.1 * jax.random.normal(ks[10], (Cr,), jnp.float32),
        fc2_w=0.2 * jax.random.normal(ks[11], (Cout, Cr), jnp.float32),
        fc2_b=0.1 * jax.random.normal(ks[11], (Cout,), jnp.float32),
        wd=0.1 * jax.random.normal(ks[12], (Cout, Cin, 1), jnp.float32),
        bd=0.1 * jax.random.normal(ks[13], (Cout,), jnp.float32),
        gd=u(ks[14], (Cout,), 0.5, 1.5), bed=0.1 * jax.random.normal(ks[15], (Cout,)),
        rmd=0.1 * jax.random.normal(ks[14], (Cout,)), rvd=u(ks[15], (Cout,), 0.5, 1.5),
        eps=eps,
    )
    return p


def fold_params(p):
    """Fold conv bias + inference BN into per-channel scale/shift (column vectors) and
    flatten conv taps into the K-fused matmul layout the kernel expects."""
    eps = p["eps"]
    Cout, Cin, _ = p["w1"].shape

    def fold(bias, gamma, beta, rm, rv):
        scale = gamma / jnp.sqrt(rv + eps)
        shift = (bias - rm) * scale + beta
        return scale[:, None], shift[:, None]          # (C, 1)

    s1, t1 = fold(p["b1"], p["g1"], p["be1"], p["rm1"], p["rv1"])
    s2, t2 = fold(p["b2"], p["g2"], p["be2"], p["rm2"], p["rv2"])
    sd, td = fold(p["bd"], p["gd"], p["bed"], p["rmd"], p["rvd"])

    # (Cout, Cin, 3) -> (Cout, 3*Cin); column block k holds tap k (x[l-1], x[l], x[l+1]).
    w1_flat = jnp.transpose(p["w1"], (0, 2, 1)).reshape(Cout, 3 * Cin)
    w2_flat = jnp.transpose(p["w2"], (0, 2, 1)).reshape(Cout, 3 * Cout)

    # Downsample 1x1 conv stacked under conv1 so both share one MXU push: its rows only
    # touch the center-tap columns.
    wd = p["wd"][:, :, 0]                              # (Cout, Cin)
    zpad = jnp.zeros((Cout, Cin), jnp.float32)
    wd_flat = jnp.concatenate([zpad, wd, zpad], axis=1)      # (Cout, 3*Cin)
    w1d = jnp.concatenate([w1_flat, wd_flat], axis=0)        # (2*Cout, 3*Cin)

    return dict(
        w1d=w1d, s1=s1, t1=t1,
        w2=w2_flat, s2=s2, t2=t2,
        fc1w=p["fc1_w"], fc1b=p["fc1_b"][:, None],
        fc2w=p["fc2_w"], fc2b=p["fc2_b"][:, None],
        sd=sd, td=td,
    )


def reference(x_ncl, p):
    """Pure-JAX reference mirroring the PyTorch forward (eval-mode BN)."""
    eps = p["eps"]

    def conv1d(x, w, b, pad):
        y = jax.lax.conv_general_dilated(
            x, w, (1,), [(pad, pad)], dimension_numbers=("NCH", "OIH", "NCH"))
        return y + b[None, :, None]

    def bn(x, g, be, rm, rv):
        return (x - rm[None, :, None]) / jnp.sqrt(rv[None, :, None] + eps) \
               * g[None, :, None] + be[None, :, None]

    out = jax.nn.relu(bn(conv1d(x_ncl, p["w1"], p["b1"], 1), p["g1"], p["be1"], p["rm1"], p["rv1"]))
    out = bn(conv1d(out, p["w2"], p["b2"], 1), p["g2"], p["be2"], p["rm2"], p["rv2"])
    # SE
    y = jnp.mean(out, axis=2)                                   # (B, Cout)
    y = jax.nn.relu(y @ p["fc1_w"].T + p["fc1_b"])
    y = jax.nn.sigmoid(y @ p["fc2_w"].T + p["fc2_b"])
    out = out * y[:, :, None]
    ident = bn(conv1d(x_ncl, p["wd"], p["bd"], 0), p["gd"], p["bed"], p["rmd"], p["rvd"])
    return jax.nn.relu(out + ident)


# ---------------------------------- main ------------------------------------

if __name__ == "__main__":
    B, Cin, Cout, L = 2, 16, 32, 128
    key = jax.random.PRNGKey(0)
    kx, kp = jax.random.split(key)
    x = jax.random.normal(kx, (B, Cin, L), jnp.float32)          # PyTorch NCL layout

    params = make_params(kp, Cin, Cout)
    kparams = fold_params(params)

    out = jax.jit(functools.partial(basic_block1d_pallas, kp=kparams))(x)
    out = jax.block_until_ready(out)

    ref = reference(x, params)
    assert out.shape == (B, Cout, L)
    assert jnp.allclose(out, ref, atol=1e-4, rtol=1e-4), \
        f"max abs err {jnp.max(jnp.abs(out - ref))}"

    print("KERNEL_OK")
</pallas_src>

<mosaic_0001>
module attributes {stable_mosaic.version = 11 : i64} {
  func.func @basic_block1d_kernel(%arg0: i32, %arg1: memref<1x16x128xf32, #tpu.memory_space<vmem>>, %arg2: memref<64x48xf32, #tpu.memory_space<vmem>>, %arg3: memref<32x1xf32, #tpu.memory_space<vmem>>, %arg4: memref<32x1xf32, #tpu.memory_space<vmem>>, %arg5: memref<32x96xf32, #tpu.memory_space<vmem>>, %arg6: memref<32x1xf32, #tpu.memory_space<vmem>>, %arg7: memref<32x1xf32, #tpu.memory_space<vmem>>, %arg8: memref<2x32xf32, #tpu.memory_space<vmem>>, %arg9: memref<2x1xf32, #tpu.memory_space<vmem>>, %arg10: memref<32x2xf32, #tpu.memory_space<vmem>>, %arg11: memref<32x1xf32, #tpu.memory_space<vmem>>, %arg12: memref<32x1xf32, #tpu.memory_space<vmem>>, %arg13: memref<32x1xf32, #tpu.memory_space<vmem>>, %arg14: memref<1x32x128xf32, #tpu.memory_space<vmem>>) attributes {dimension_semantics = [#tpu.dimension_semantics<parallel>], iteration_bounds = array<i64: 2>, scalar_prefetch = 0 : i64, scratch_operands = 0 : i64, tpu.core_type = #tpu.core_type<tc>, window_params = [{transform_indices = @transform_0, window_bounds = array<i64: 1, 16, 128>}, {pipeline_mode = #tpu.pipeline_mode<synchronous>, transform_indices = @transform_1, window_bounds = array<i64: 64, 48>}, {pipeline_mode = #tpu.pipeline_mode<synchronous>, transform_indices = @transform_2, window_bounds = array<i64: 32, 1>}, {pipeline_mode = #tpu.pipeline_mode<synchronous>, transform_indices = @transform_3, window_bounds = array<i64: 32, 1>}, {pipeline_mode = #tpu.pipeline_mode<synchronous>, transform_indices = @transform_4, window_bounds = array<i64: 32, 96>}, {pipeline_mode = #tpu.pipeline_mode<synchronous>, transform_indices = @transform_5, window_bounds = array<i64: 32, 1>}, {pipeline_mode = #tpu.pipeline_mode<synchronous>, transform_indices = @transform_6, window_bounds = array<i64: 32, 1>}, {pipeline_mode = #tpu.pipeline_mode<synchronous>, transform_indices = @transform_7, window_bounds = array<i64: 2, 32>}, {pipeline_mode = #tpu.pipeline_mode<synchronous>, transform_indices = @transform_8, window_bounds = array<i64: 2, 1>}, {pipeline_mode = #tpu.pipeline_mode<synchronous>, transform_indices = @transform_9, window_bounds = array<i64: 32, 2>}, {pipeline_mode = #tpu.pipeline_mode<synchronous>, transform_indices = @transform_10, window_bounds = array<i64: 32, 1>}, {pipeline_mode = #tpu.pipeline_mode<synchronous>, transform_indices = @transform_11, window_bounds = array<i64: 32, 1>}, {pipeline_mode = #tpu.pipeline_mode<synchronous>, transform_indices = @transform_12, window_bounds = array<i64: 32, 1>}, {transform_indices = @transform_13, window_bounds = array<i64: 1, 32, 128>}]} {
    %c0 = arith.constant 0 : index
    %c0_0 = arith.constant 0 : index
    %c0_1 = arith.constant 0 : index
    %0 = vector.load %arg1[%c0, %c0_0, %c0_1] : memref<1x16x128xf32, #tpu.memory_space<vmem>>, vector<1x16x128xf32>
    %1 = vector.shape_cast %0 : vector<1x16x128xf32> to vector<16x128xf32>
    %2 = tpu.iota {dimensions = array<i32: 1>} : vector<1x128xi32>
    %c1_i32 = arith.constant 1 : i32
    %3 = vector.broadcast %c1_i32 : i32 to vector<1x128xi32>
    %4 = arith.cmpi sge, %2, %3 : vector<1x128xi32>
    %c127_i32 = arith.constant 127 : i32
    %5 = vector.broadcast %c127_i32 : i32 to vector<1x128xi32>
    %6 = arith.cmpi slt, %2, %5 : vector<1x128xi32>
    %c0_2 = arith.constant 0 : index
    %c0_3 = arith.constant 0 : index
    %7 = vector.load %arg2[%c0_2, %c0_3] : memref<64x48xf32, #tpu.memory_space<vmem>>, vector<64x48xf32>
    %c1_i32_4 = arith.constant 1 : i32
    %8 = tpu.dynamic_rotate %1 by %c1_i32_4 dim 1 : vector<16x128xf32>, i32 -> vector<16x128xf32>
    %cst = arith.constant 0.000000e+00 : f32
    %9 = vector.shape_cast %4 : vector<1x128xi1> to vector<1x128xi1>
    %10 = vector.broadcast %9 : vector<1x128xi1> to vector<16x128xi1>
    %11 = vector.broadcast %cst : f32 to vector<16x128xf32>
    %12 = arith.select %10, %8, %11 : vector<16x128xi1>, vector<16x128xf32>
    %c127_i32_5 = arith.constant 127 : i32
    %13 = tpu.dynamic_rotate %1 by %c127_i32_5 dim 1 : vector<16x128xf32>, i32 -> vector<16x128xf32>
    %cst_6 = arith.constant 0.000000e+00 : f32
    %14 = vector.shape_cast %6 : vector<1x128xi1> to vector<1x128xi1>
    %15 = vector.broadcast %14 : vector<1x128xi1> to vector<16x128xi1>
    %16 = vector.broadcast %cst_6 : f32 to vector<16x128xf32>
    %17 = arith.select %15, %13, %16 : vector<16x128xi1>, vector<16x128xf32>
    %18 = tpu.concatenate %12, %1, %17 in 0 : vector<16x128xf32>, vector<16x128xf32>, vector<16x128xf32> -> vector<48x128xf32>
    %cst_7 = arith.constant dense<0.000000e+00> : vector<64x128xf32>
    %19 = tpu.matmul %7, %18, %cst_7 {dimension_numbers = #tpu.dot_dimension_numbers<[1], [0], [0], [1], [0, 0, 1, 1], [], []>} : vector<64x48xf32>, vector<48x128xf32>, vector<64x128xf32> -> vector<64x128xf32>
    %20 = vector.extract_strided_slice %19 {offsets = [0, 0], sizes = [32, 128], strides = [1, 1]} : vector<64x128xf32> to vector<32x128xf32>
    %21 = vector.extract_strided_slice %19 {offsets = [32, 0], sizes = [32, 128], strides = [1, 1]} : vector<64x128xf32> to vector<32x128xf32>
    %c0_8 = arith.constant 0 : index
    %c0_9 = arith.constant 0 : index
    %22 = vector.load %arg12[%c0_8, %c0_9] : memref<32x1xf32, #tpu.memory_space<vmem>>, vector<32x1xf32>
    %23 = vector.broadcast %22 : vector<32x1xf32> to vector<32x128xf32>
    %24 = arith.mulf %21, %23 : vector<32x128xf32>
    %c0_10 = arith.constant 0 : index
    %c0_11 = arith.constant 0 : index
    %25 = vector.load %arg13[%c0_10, %c0_11] : memref<32x1xf32, #tpu.memory_space<vmem>>, vector<32x1xf32>
    %26 = vector.broadcast %25 : vector<32x1xf32> to vector<32x128xf32>
    %27 = arith.addf %24, %26 : vector<32x128xf32>
    %c0_12 = arith.constant 0 : index
    %c0_13 = arith.constant 0 : index
    %28 = vector.load %arg3[%c0_12, %c0_13] : memref<32x1xf32, #tpu.memory_space<vmem>>, vector<32x1xf32>
    %29 = vector.broadcast %28 : vector<32x1xf32> to vector<32x128xf32>
    %30 = arith.mulf %20, %29 : vector<32x128xf32>
    %c0_14 = arith.constant 0 : index
    %c0_15 = arith.constant 0 : index
    %31 = vector.load %arg4[%c0_14, %c0_15] : memref<32x1xf32, #tpu.memory_space<vmem>>, vector<32x1xf32>
    %32 = vector.broadcast %31 : vector<32x1xf32> to vector<32x128xf32>
    %33 = arith.addf %30, %32 : vector<32x128xf32>
    %cst_16 = arith.constant 0.000000e+00 : f32
    %34 = vector.broadcast %cst_16 : f32 to vector<32x128xf32>
    %35 = arith.maximumf %33, %34 : vector<32x128xf32>
    %c0_17 = arith.constant 0 : index
    %c0_18 = arith.constant 0 : index
    %36 = vector.load %arg5[%c0_17, %c0_18] : memref<32x96xf32, #tpu.memory_space<vmem>>, vector<32x96xf32>
    %c1_i32_19 = arith.constant 1 : i32
    %37 = tpu.dynamic_rotate %35 by %c1_i32_19 dim 1 : vector<32x128xf32>, i32 -> vector<32x128xf32>
    %cst_20 = arith.constant 0.000000e+00 : f32
    %38 = vector.shape_cast %4 : vector<1x128xi1> to vector<1x128xi1>
    %39 = vector.broadcast %38 : vector<1x128xi1> to vector<32x128xi1>
    %40 = vector.broadcast %cst_20 : f32 to vector<32x128xf32>
    %41 = arith.select %39, %37, %40 : vector<32x128xi1>, vector<32x128xf32>
    %c127_i32_21 = arith.constant 127 : i32
    %42 = tpu.dynamic_rotate %35 by %c127_i32_21 dim 1 : vector<32x128xf32>, i32 -> vector<32x128xf32>
    %cst_22 = arith.constant 0.000000e+00 : f32
    %43 = vector.shape_cast %6 : vector<1x128xi1> to vector<1x128xi1>
    %44 = vector.broadcast %43 : vector<1x128xi1> to vector<32x128xi1>
    %45 = vector.broadcast %cst_22 : f32 to vector<32x128xf32>
    %46 = arith.select %44, %42, %45 : vector<32x128xi1>, vector<32x128xf32>
    %47 = tpu.concatenate %41, %35, %46 in 0 : vector<32x128xf32>, vector<32x128xf32>, vector<32x128xf32> -> vector<96x128xf32>
    %cst_23 = arith.constant dense<0.000000e+00> : vector<32x128xf32>
    %48 = tpu.matmul %36, %47, %cst_23 {dimension_numbers = #tpu.dot_dimension_numbers<[1], [0], [0], [1], [0, 0, 1, 1], [], []>} : vector<32x96xf32>, vector<96x128xf32>, vector<32x128xf32> -> vector<32x128xf32>
    %c0_24 = arith.constant 0 : index
    %c0_25 = arith.constant 0 : index
    %49 = vector.load %arg6[%c0_24, %c0_25] : memref<32x1xf32, #tpu.memory_space<vmem>>, vector<32x1xf32>
    %50 = vector.broadcast %49 : vector<32x1xf32> to vector<32x128xf32>
    %51 = arith.mulf %48, %50 : vector<32x128xf32>
    %c0_26 = arith.constant 0 : index
    %c0_27 = arith.constant 0 : index
    %52 = vector.load %arg7[%c0_26, %c0_27] : memref<32x1xf32, #tpu.memory_space<vmem>>, vector<32x1xf32>
    %53 = vector.broadcast %52 : vector<32x1xf32> to vector<32x128xf32>
    %54 = arith.addf %51, %53 : vector<32x128xf32>
    %cst_28 = arith.constant dense<0.000000e+00> : vector<32xf32>
    %55 = vector.multi_reduction <add>, %54, %cst_28 [1] : vector<32x128xf32> to vector<32xf32>
    %56 = vector.shape_cast %55 : vector<32xf32> to vector<32x1xf32>
    %cst_29 = arith.constant 1.280000e+02 : f32
    %57 = vector.broadcast %cst_29 : f32 to vector<32x1xf32>
    %58 = arith.divf %56, %57 : vector<32x1xf32>
    %c0_30 = arith.constant 0 : index
    %c0_31 = arith.constant 0 : index
    %59 = vector.load %arg8[%c0_30, %c0_31] : memref<2x32xf32, #tpu.memory_space<vmem>>, vector<2x32xf32>
    %cst_32 = arith.constant dense<0.000000e+00> : vector<2x1xf32>
    %60 = tpu.matmul %59, %58, %cst_32 {dimension_numbers = #tpu.dot_dimension_numbers<[1], [0], [0], [1], [0, 0, 1, 1], [], []>} : vector<2x32xf32>, vector<32x1xf32>, vector<2x1xf32> -> vector<2x1xf32>
    %c0_33 = arith.constant 0 : index
    %c0_34 = arith.constant 0 : index
    %61 = vector.load %arg9[%c0_33, %c0_34] : memref<2x1xf32, #tpu.memory_space<vmem>>, vector<2x1xf32>
    %62 = arith.addf %60, %61 : vector<2x1xf32>
    %cst_35 = arith.constant 0.000000e+00 : f32
    %63 = vector.broadcast %cst_35 : f32 to vector<2x1xf32>
    %64 = arith.maximumf %62, %63 : vector<2x1xf32>
    %c0_36 = arith.constant 0 : index
    %c0_37 = arith.constant 0 : index
    %65 = vector.load %arg10[%c0_36, %c0_37] : memref<32x2xf32, #tpu.memory_space<vmem>>, vector<32x2xf32>
    %cst_38 = arith.constant dense<0.000000e+00> : vector<32x1xf32>
    %66 = tpu.matmul %65, %64, %cst_38 {dimension_numbers = #tpu.dot_dimension_numbers<[1], [0], [0], [1], [0, 0, 1, 1], [], []>} : vector<32x2xf32>, vector<2x1xf32>, vector<32x1xf32> -> vector<32x1xf32>
    %c0_39 = arith.constant 0 : index
    %c0_40 = arith.constant 0 : index
    %67 = vector.load %arg11[%c0_39, %c0_40] : memref<32x1xf32, #tpu.memory_space<vmem>>, vector<32x1xf32>
    %68 = arith.addf %66, %67 : vector<32x1xf32>
    %cst_41 = arith.constant 0.000000e+00 : f32
    %69 = vector.broadcast %cst_41 : f32 to vector<32x1xf32>
    %70 = arith.subf %69, %68 : vector<32x1xf32>
    %71 = math.exp %70 : vector<32x1xf32>
    %cst_42 = arith.constant 1.000000e+00 : f32
    %72 = vector.broadcast %cst_42 : f32 to vector<32x1xf32>
    %73 = arith.addf %72, %71 : vector<32x1xf32>
    %cst_43 = arith.constant 1.000000e+00 : f32
    %74 = vector.broadcast %cst_43 : f32 to vector<32x1xf32>
    %75 = arith.divf %74, %73 : vector<32x1xf32>
    %76 = vector.broadcast %75 : vector<32x1xf32> to vector<32x128xf32>
    %77 = arith.mulf %54, %76 : vector<32x128xf32>
    %78 = arith.addf %77, %27 : vector<32x128xf32>
    %cst_44 = arith.constant 0.000000e+00 : f32
    %79 = vector.broadcast %cst_44 : f32 to vector<32x128xf32>
    %80 = arith.maximumf %78, %79 : vector<32x128xf32>
    %81 = vector.shape_cast %80 : vector<32x128xf32> to vector<1x32x128xf32>
    %c0_45 = arith.constant 0 : index
    %c0_46 = arith.constant 0 : index
    %c0_47 = arith.constant 0 : index
    %82 = vector.load %arg14[%c0_45, %c0_46, %c0_47] : memref<1x32x128xf32, #tpu.memory_space<vmem>>, vector<1x32x128xf32>
    tpu.vector_store %arg14[%c0_45, %c0_46, %c0_47], %81 {strides = array<i32>} : memref<1x32x128xf32, #tpu.memory_space<vmem>>, vector<1x32x128xf32>,
    return
  }
  func.func @transform_0(%arg0: i32) -> (i32, i32, i32) {
    %c0_i32 = arith.constant 0 : i32
    %c0_i32_0 = arith.constant 0 : i32
    %c0_i32_1 = arith.constant 0 : i32
    return %arg0, %c0_i32, %c0_i32_0 : i32, i32, i32
  }
  func.func @transform_1(%arg0: i32) -> (i32, i32) {
    %c0_i32 = arith.constant 0 : i32
    %c0_i32_0 = arith.constant 0 : i32
    %c0_i32_1 = arith.constant 0 : i32
    return %c0_i32, %c0_i32_0 : i32, i32
  }
  func.func @transform_2(%arg0: i32) -> (i32, i32) {
    %c0_i32 = arith.constant 0 : i32
    %c0_i32_0 = arith.constant 0 : i32
    %c0_i32_1 = arith.constant 0 : i32
    return %c0_i32, %c0_i32_0 : i32, i32
  }
  func.func @transform_3(%arg0: i32) -> (i32, i32) {
    %c0_i32 = arith.constant 0 : i32
    %c0_i32_0 = arith.constant 0 : i32
    %c0_i32_1 = arith.constant 0 : i32
    return %c0_i32, %c0_i32_0 : i32, i32
  }
  func.func @transform_4(%arg0: i32) -> (i32, i32) {
    %c0_i32 = arith.constant 0 : i32
    %c0_i32_0 = arith.constant 0 : i32
    %c0_i32_1 = arith.constant 0 : i32
    return %c0_i32, %c0_i32_0 : i32, i32
  }
  func.func @transform_5(%arg0: i32) -> (i32, i32) {
    %c0_i32 = arith.constant 0 : i32
    %c0_i32_0 = arith.constant 0 : i32
    %c0_i32_1 = arith.constant 0 : i32
    return %c0_i32, %c0_i32_0 : i32, i32
  }
  func.func @transform_6(%arg0: i32) -> (i32, i32) {
    %c0_i32 = arith.constant 0 : i32
    %c0_i32_0 = arith.constant 0 : i32
    %c0_i32_1 = arith.constant 0 : i32
    return %c0_i32, %c0_i32_0 : i32, i32
  }
  func.func @transform_7(%arg0: i32) -> (i32, i32) {
    %c0_i32 = arith.constant 0 : i32
    %c0_i32_0 = arith.constant 0 : i32
    %c0_i32_1 = arith.constant 0 : i32
    return %c0_i32, %c0_i32_0 : i32, i32
  }
  func.func @transform_8(%arg0: i32) -> (i32, i32) {
    %c0_i32 = arith.constant 0 : i32
    %c0_i32_0 = arith.constant 0 : i32
    %c0_i32_1 = arith.constant 0 : i32
    return %c0_i32, %c0_i32_0 : i32, i32
  }
  func.func @transform_9(%arg0: i32) -> (i32, i32) {
    %c0_i32 = arith.constant 0 : i32
    %c0_i32_0 = arith.constant 0 : i32
    %c0_i32_1 = arith.constant 0 : i32
    return %c0_i32, %c0_i32_0 : i32, i32
  }
  func.func @transform_10(%arg0: i32) -> (i32, i32) {
    %c0_i32 = arith.constant 0 : i32
    %c0_i32_0 = arith.constant 0 : i32
    %c0_i32_1 = arith.constant 0 : i32
    return %c0_i32, %c0_i32_0 : i32, i32
  }
  func.func @transform_11(%arg0: i32) -> (i32, i32) {
    %c0_i32 = arith.constant 0 : i32
    %c0_i32_0 = arith.constant 0 : i32
    %c0_i32_1 = arith.constant 0 : i32
    return %c0_i32, %c0_i32_0 : i32, i32
  }
  func.func @transform_12(%arg0: i32) -> (i32, i32) {
    %c0_i32 = arith.constant 0 : i32
    %c0_i32_0 = arith.constant 0 : i32
    %c0_i32_1 = arith.constant 0 : i32
    return %c0_i32, %c0_i32_0 : i32, i32
  }
  func.func @transform_13(%arg0: i32) -> (i32, i32, i32) {
    %c0_i32 = arith.constant 0 : i32
    %c0_i32_0 = arith.constant 0 : i32
    %c0_i32_1 = arith.constant 0 : i32
    return %arg0, %c0_i32, %c0_i32_0 : i32, i32, i32
  }
}

</mosaic_0001>

<bundles_post_ra>
// kernel: basic_block1d_pallas.1
= control target key start
LH: loop header
LB: loop body
LE: loop exit
PB: predicated region body
PF: predicated region fallthrough
CT: control target
= control target key end

     0   :  { %s2876_s0 = inlined_call_operand.hbm [shape: f32[2,16,128], index: 0, kind: input, shape index: {}]   ;;  %s2877_s1 = inlined_call_operand.hbm [shape: f32[64,48], index: 1, kind: input, shape index: {}]   ;;  %s2878_s2 = inlined_call_operand.hbm [shape: f32[32,1], index: 2, kind: input, shape index: {}]   ;;  %s2879_s3 = inlined_call_operand.hbm [shape: f32[32,1], index: 3, kind: input, shape index: {}]   ;;  %s2880_s4 = inlined_call_operand.hbm [shape: f32[32,96], index: 4, kind: input, shape index: {}]   ;;  %s2881_s5 = inlined_call_operand.hbm [shape: f32[32,1], index: 5, kind: input, shape index: {}]   ;;  %s2882_s6 = inlined_call_operand.hbm [shape: f32[32,1], index: 6, kind: input, shape index: {}]   ;;  %s2883_s7 = inlined_call_operand.vmem [shape: f32[2,32], index: 7, kind: input, shape index: {}]   ;;  %s2884_s8 = inlined_call_operand.vmem [shape: f32[2,1], index: 8, kind: input, shape index: {}]   ;;  %s2885_s9 = inlined_call_operand.hbm [shape: f32[32,2], index: 9, kind: input, shape index: {}]   ;;  %s2886_s10 = inlined_call_operand.hbm [shape: f32[32,1], index: 10, kind: input, shape index: {}]   ;;  %s2887_s11 = inlined_call_operand.hbm [shape: f32[32,1], index: 11, kind: input, shape index: {}]   ;;  %s2888_s12 = inlined_call_operand.vmem [shape: f32[32,1], index: 12, kind: input, shape index: {}]   ;;  %s2889_s13 = inlined_call_operand.hbm [shape: f32[2,32,128], index: 13, kind: output, shape index: {}]  }
   0x1   :  { %2897 = sst [smem:[#allocation28_spill]] %s2877_s1 }
   0x2   :  { %2898 = sst [smem:[#allocation29_spill]] %s2883_s7 }
   0x3   :  { %2899 = sst [smem:[#allocation30_spill]] %s2884_s8 }
   0x4   :  { %2900 = sst [smem:[#allocation31_spill]] %s2888_s12 }
   0x5   :  { %2901 = sst [smem:[#allocation32_spill]] %s2889_s13 }
   0x6   :  { %18 = vsyncpa [#allocation3], 0 }
   0x7   :  { %20 = vsyncpa [#allocation3 + $0x1], 0 }
   0x8   :  { %21 = vsyncpa [#allocation6], 0 }
   0x9   :  { %22 = vsyncpa [#allocation9], 0 }
   0xa   :  { %23 = vsyncpa [#allocation12], 0 }
   0xb   :  { %24 = vsyncpa [#allocation15], 0 }
   0xc   :  { %25 = vsyncpa [#allocation18], 0 }
   0xd   :  { %26 = vsyncpa [#allocation4], 0 }
   0xe   :  { %28 = vsyncpa [#allocation4 + $0x1], 0  ;;  %s2368_s25 = smov 0   ;;  %s2370_s26 = smov 0  }
   0xf   :  { %s2372_s27 = smov 0   ;;  %s2374_s28 = smov 0  }
  0x10 LB: > { %s2277_s29 = smov [#allocation5]   ;;  %s2389_s14 = sadd.s32 4294967295, %s2275_s28   ;;  %s2275_s28 = sphi %s2374_s28, %s2939_s28   ;;  %s2271_s27 = sphi %s2372_s27, %s2938_s27   ;;  %s2267_s26 = sphi %s2370_s26, %s2937_s26   ;;  %s2263_s25 = sphi %s2368_s25, %s2936_s25  }
  0x11   : > { %s355_s30 = sshll.u32 %s2277_s29, 4  ;;  %p1482_p0 = scmp.ge.s32.totalorder %s2275_s28, 1  ;;  %s2394_s30 = int_to_ptr.vmem [resolvable:$true] %s355_s30 }
  0x12   : > { %p2893_p1 = scmp.eq.s32.totalorder %s2389_s14, 0  ;;  %p343_p2 = scmp.lt.s32.totalorder %s2275_s28, 3 }
  0x13   : > { %s2278_s16 = smov [#allocation8]   ;;  %s2279_s19 = smov [#allocation11]  }
  0x14   : > { %p2396_p3 = pnand %p1482_p0, %p343_p2  ;;  %s381_s17 = sshll.u32 %s2278_s16, 4  ;;  %s2409_s17 = int_to_ptr.vmem [resolvable:$true] %s381_s17 }
  0x15   : > { %s407_s20 = sshll.u32 %s2279_s19, 4  ;;  %s2905_s1 = sld [smem:[#allocation28_spill]]  ;;  %s2411_s20 = int_to_ptr.vmem [resolvable:$true] %s407_s20 }
  0x16   : > { %s2902_s15 = scalar_select %p2396_p3, 1, 0 }
  0x17   : > { %p1752_p5 = pneg %p2396_p3 }
  0x18   : > { %2903 = sst [smem:[#allocation27_spill]] %s2902_s15 }
  0x19   : > { %p2405_p6 = pnand %p1752_p5, %p2893_p1 }
  0x1b   : > { %s1907_s23 = scalar_lea.hbm %s2905_s1, 1024  ;;  %p2421_p8 = pneg %p2405_p6 }
  0x1c   : > { %p1908_p7 = scmp.ne.s32.totalorder %s2905_s1, %s1907_s23  ;;  %p1914_p11 = scmp.lt.u32.totalorder %s1907_s23, %s2905_s1 }
  0x1e   : > { %p1910_p9 = pnand %p2421_p8, %p1908_p7 }
  0x20   : > { %p1911_p10 = pneg %p1910_p9 }
  0x22   : > { %p1916_p12 = pnand %p1914_p11, %p1911_p10 }
  0x24   : > { %1919 = shalt.err (!%p1916_p12)
}
  0x25   : > { %s1920_s21 = scalar_lea.vmem %s2394_s30, 1024  ;;  %p1928_p5 = scmp.lt.s32.totalorder %s2394_s30, %s2394_s30 }
  0x26   : > { %p1921_p13 = scmp.ne.s32.totalorder %s2394_s30, %s1920_s21  ;;  %p1929_p4 = scmp.lt.s32.totalorder %s1920_s21, %s1920_s21 }
  0x28   : > { %p1923_p0 = pnand %p1921_p13, %p2421_p8  ;;  %p1930_p7 = por %p1929_p4, %p1928_p5 }
  0x2a   : > { %p1924_p2 = pneg %p1923_p0 }
  0x2c   : > { %p1931_p9 = pnand %p1930_p7, %p1924_p2 }
  0x2e   : > { %1934 = shalt.err (!%p1931_p9)
}
  0x2f   : > { %s2895_s22 = smov 128   ;;  %s2281_s13 = smov 8  }
  0x30   : > { %1755 = dma.hbm_to_vmem [thread:$0]  (!%p2405_p6), %s2905_s1, 1024, %s2394_s30, [#allocation6], %s2895_s22, %s2895_s22, %s2281_s13  }
  0x31   : > { %s1935_s21 = scalar_lea.hbm %s2879_s3, 512 }
  0x32   : > { %p1936_p4 = scmp.ne.s32.totalorder %s2879_s3, %s1935_s21  ;;  %p1942_p12 = scmp.lt.u32.totalorder %s1935_s21, %s2879_s3 }
  0x34   : > { %p1938_p10 = pnand %p1936_p4, %p2421_p8 }
  0x36   : > { %p1939_p11 = pneg %p1938_p10 }
  0x38   : > { %p1944_p13 = pnand %p1942_p12, %p1939_p11 }
  0x3a   : > { %1947 = shalt.err (!%p1944_p13)
}
  0x3b   : > { %s1948_s30 = scalar_lea.vmem %s2409_s17, 512  ;;  %p1956_p7 = scmp.lt.s32.totalorder %s2409_s17, %s2409_s17 }
  0x3c   : > { %p1949_p0 = scmp.ne.s32.totalorder %s2409_s17, %s1948_s30  ;;  %p1957_p9 = scmp.lt.s32.totalorder %s1948_s30, %s1948_s30 }
  0x3e   : > { %p1951_p2 = pnand %p1949_p0, %p2421_p8  ;;  %p1958_p4 = por %p1957_p9, %p1956_p7 }
  0x40   : > { %p1952_p5 = pneg %p1951_p2 }
  0x42   : > { %p1959_p10 = pnand %p1958_p4, %p1952_p5 }
  0x44   : > { %1962 = shalt.err (!%p1959_p10)
}
  0x45   : > { %1761 = dma.hbm_to_vmem [thread:$0]  (!%p2405_p6), %s2879_s3, 512, %s2409_s17, [#allocation9], %s2895_s22, %s2895_s22, %s2281_s13  }
  0x46   : > { %s1963_s23 = scalar_lea.hbm %s2881_s5, 512 }
  0x47   : > { %p1964_p11 = scmp.ne.s32.totalorder %s2881_s5, %s1963_s23  ;;  %p1970_p0 = scmp.lt.u32.totalorder %s1963_s23, %s2881_s5 }
  0x49   : > { %p1966_p12 = pnand %p1964_p11, %p2421_p8 }
  0x4b   : > { %p1967_p13 = pneg %p1966_p12 }
  0x4d   : > { %p1972_p2 = pnand %p1970_p0, %p1967_p13 }
  0x4f   : > { %1975 = shalt.err (!%p1972_p2)
}
  0x50   : > { %s1976_s17 = scalar_lea.vmem %s2411_s20, 512  ;;  %p1984_p4 = scmp.lt.s32.totalorder %s2411_s20, %s2411_s20 }
  0x51   : > { %p1977_p5 = scmp.ne.s32.totalorder %s2411_s20, %s1976_s17  ;;  %p1985_p10 = scmp.lt.s32.totalorder %s1976_s17, %s1976_s17 }
  0x53   : > { %p1979_p7 = pnand %p1977_p5, %p2421_p8  ;;  %p1986_p11 = por %p1985_p10, %p1984_p4 }
  0x55   : > { %p1980_p9 = pneg %p1979_p7 }
  0x57   : > { %p1987_p12 = pnand %p1986_p11, %p1980_p9 }
  0x59   : > { %1990 = shalt.err (!%p1987_p12)
}
  0x5a   : > { %1767 = dma.hbm_to_vmem [thread:$0]  (!%p2405_p6), %s2881_s5, 512, %s2411_s20, [#allocation12], %s2895_s22, %s2895_s22, %s2281_s13  }
  0x5b   : > { %s2282_s8 = smov [#allocation14]   ;;  %s2283_s15 = smov [#allocation7]  }
  0x5c   : > { %s439_s12 = sshll.u32 %s2282_s8, 4  ;;  %s368_s23 = sshll.u32 %s2283_s15, 4  ;;  %s440_s12 = int_to_ptr.vmem [resolvable:$true] %s439_s12  ;;  %s369_s23 = int_to_ptr.vmem [resolvable:$true] %s368_s23 }
  0x5d   : > { %s1991_s19 = scalar_lea.hbm %s2885_s9, 512 }
  0x5e   : > { %p1992_p13 = scmp.ne.s32.totalorder %s2885_s9, %s1991_s19  ;;  %p1998_p5 = scmp.lt.u32.totalorder %s1991_s19, %s2885_s9 }
  0x60   : > { %p1994_p0 = pnand %p1992_p13, %p2421_p8 }
  0x62   : > { %p1995_p2 = pneg %p1994_p0 }
  0x64   : > { %p2000_p7 = pnand %p1998_p5, %p1995_p2 }
  0x66   : > { %2003 = shalt.err (!%p2000_p7)
}
  0x67   : > { %s2004_s20 = scalar_lea.vmem %s440_s12, 512  ;;  %p2012_p11 = scmp.lt.s32.totalorder %s440_s12, %s440_s12 }
  0x68   : > { %p2005_p9 = scmp.ne.s32.totalorder %s440_s12, %s2004_s20  ;;  %p2013_p12 = scmp.lt.s32.totalorder %s2004_s20, %s2004_s20 }
  0x6a   : > { %p2007_p4 = pnand %p2005_p9, %p2421_p8  ;;  %p2014_p1 = por %p2013_p12, %p2012_p11 }
  0x6c   : > { %p2008_p10 = pneg %p2007_p4 }
  0x6e   : > { %p2015_p3 = pnand %p2014_p1, %p2008_p10 }
  0x70   : > { %2018 = shalt.err (!%p2015_p3)
}
  0x71   : > { %1773 = dma.hbm_to_vmem [thread:$0]  (!%p2405_p6), %s2885_s9, 512, %s440_s12, [#allocation15], %s2895_s22, %s2895_s22, %s2281_s13  }
  0x72   : > { %s2019_s24 = scalar_lea.hbm %s2878_s2, 512 }
  0x73   : > { %p2020_p1 = scmp.ne.s32.totalorder %s2878_s2, %s2019_s24  ;;  %p2026_p0 = scmp.lt.u32.totalorder %s2019_s24, %s2878_s2 }
  0x75   : > { %p2022_p3 = pnand %p2020_p1, %p2421_p8 }
  0x77   : > { %p2023_p13 = pneg %p2022_p3 }
  0x79   : > { %p2028_p2 = pnand %p2026_p0, %p2023_p13 }
  0x7b   : > { %2031 = shalt.err (!%p2028_p2)
}
  0x7c   : > { %s2032_s30 = scalar_lea.vmem %s369_s23, 512  ;;  %p2040_p4 = scmp.lt.s32.totalorder %s369_s23, %s369_s23 }
  0x7d   : > { %p2033_p5 = scmp.ne.s32.totalorder %s369_s23, %s2032_s30  ;;  %p2041_p10 = scmp.lt.s32.totalorder %s2032_s30, %s2032_s30 }
  0x7f   : > { %p2035_p7 = pnand %p2033_p5, %p2421_p8  ;;  %p2042_p11 = por %p2041_p10, %p2040_p4 }
  0x81   : > { %p2036_p9 = pneg %p2035_p7 }
  0x83   : > { %p2043_p12 = pnand %p2042_p11, %p2036_p9 }
  0x85   : > { %2046 = shalt.err (!%p2043_p12)
}
  0x86   : > { %1758 = dma.hbm_to_vmem [thread:$0]  (!%p2405_p6), %s2878_s2, 512, %s369_s23, [#allocation6], %s2895_s22, %s2895_s22, %s2281_s13  }
  0x87   : > { %s2284_s1 = smov [#allocation10]   ;;  %s2285_s8 = smov [#allocation13]  }
  0x88   : > { %s394_s7 = sshll.u32 %s2284_s1, 4  ;;  %s420_s15 = sshll.u32 %s2285_s8, 4  ;;  %s395_s7 = int_to_ptr.vmem [resolvable:$true] %s394_s7  ;;  %s421_s15 = int_to_ptr.vmem [resolvable:$true] %s420_s15 }
  0x89   : > { %s2047_s19 = scalar_lea.hbm %s2880_s4, 512 }
  0x8a   : > { %p2048_p1 = scmp.ne.s32.totalorder %s2880_s4, %s2047_s19  ;;  %p2054_p0 = scmp.lt.u32.totalorder %s2047_s19, %s2880_s4 }
  0x8c   : > { %p2050_p3 = pnand %p2048_p1, %p2421_p8 }
  0x8e   : > { %p2051_p13 = pneg %p2050_p3 }
  0x90   : > { %p2056_p2 = pnand %p2054_p0, %p2051_p13 }
  0x92   : > { %2059 = shalt.err (!%p2056_p2)
}
  0x93   : > { %s2060_s23 = scalar_lea.vmem %s395_s7, 512  ;;  %p2068_p4 = scmp.lt.s32.totalorder %s395_s7, %s395_s7 }
  0x94   : > { %p2061_p5 = scmp.ne.s32.totalorder %s395_s7, %s2060_s23  ;;  %p2069_p10 = scmp.lt.s32.totalorder %s2060_s23, %s2060_s23 }
  0x96   : > { %p2063_p7 = pnand %p2061_p5, %p2421_p8  ;;  %p2070_p11 = por %p2069_p10, %p2068_p4 }
  0x98   : > { %p2064_p9 = pneg %p2063_p7 }
  0x9a   : > { %p2071_p12 = pnand %p2070_p11, %p2064_p9 }
  0x9c   : > { %2074 = shalt.err (!%p2071_p12)
}
  0x9d   : > { %1764 = dma.hbm_to_vmem [thread:$0]  (!%p2405_p6), %s2880_s4, 512, %s395_s7, [#allocation9], %s2895_s22, %s2895_s22, %s2281_s13  }
  0x9e   : > { %s2075_s29 = scalar_lea.hbm %s2882_s6, 512 }
  0x9f   : > { %p2076_p1 = scmp.ne.s32.totalorder %s2882_s6, %s2075_s29  ;;  %p2082_p0 = scmp.lt.u32.totalorder %s2075_s29, %s2882_s6 }
  0xa1   : > { %p2078_p3 = pnand %p2076_p1, %p2421_p8 }
  0xa3   : > { %p2079_p13 = pneg %p2078_p3 }
  0xa5   : > { %p2084_p2 = pnand %p2082_p0, %p2079_p13 }
  0xa7   : > { %2087 = shalt.err (!%p2084_p2)
}
  0xa8   : > { %s2088_s12 = scalar_lea.vmem %s421_s15, 512  ;;  %p2096_p4 = scmp.lt.s32.totalorder %s421_s15, %s421_s15 }
  0xa9   : > { %p2089_p5 = scmp.ne.s32.totalorder %s421_s15, %s2088_s12  ;;  %p2097_p10 = scmp.lt.s32.totalorder %s2088_s12, %s2088_s12 }
  0xab   : > { %p2091_p7 = pnand %p2089_p5, %p2421_p8  ;;  %p2098_p11 = por %p2097_p10, %p2096_p4 }
  0xad   : > { %p2092_p9 = pneg %p2091_p7 }
  0xaf   : > { %p2099_p12 = pnand %p2098_p11, %p2092_p9 }
  0xb1   : > { %2102 = shalt.err (!%p2099_p12)
}
  0xb2   : > { %1770 = dma.hbm_to_vmem [thread:$0]  (!%p2405_p6), %s2882_s6, 512, %s421_s15, [#allocation12], %s2895_s22, %s2895_s22, %s2281_s13  }
  0xb3   : > { %s2286_s20 = smov [#allocation16]   ;;  %s2287_s8 = smov [#allocation17]  }
  0xb4   : > { %s452_s1 = sshll.u32 %s2286_s20, 4  ;;  %s465_s24 = sshll.u32 %s2287_s8, 4  ;;  %s453_s1 = int_to_ptr.vmem [resolvable:$true] %s452_s1  ;;  %s466_s24 = int_to_ptr.vmem [resolvable:$true] %s465_s24 }
  0xb5   : > { %s2103_s21 = scalar_lea.hbm %s2886_s10, 512 }
  0xb6   : > { %p2104_p1 = scmp.ne.s32.totalorder %s2886_s10, %s2103_s21  ;;  %p2110_p0 = scmp.lt.u32.totalorder %s2103_s21, %s2886_s10 }
  0xb8   : > { %p2106_p3 = pnand %p2104_p1, %p2421_p8 }
  0xba   : > { %p2107_p13 = pneg %p2106_p3 }
  0xbc   : > { %p2112_p2 = pnand %p2110_p0, %p2107_p13 }
  0xbe   : > { %2115 = shalt.err (!%p2112_p2)
}
  0xbf   : > { %s2116_s15 = scalar_lea.vmem %s453_s1, 512  ;;  %p2124_p4 = scmp.lt.s32.totalorder %s453_s1, %s453_s1 }
  0xc0   : > { %p2117_p5 = scmp.ne.s32.totalorder %s453_s1, %s2116_s15  ;;  %p2125_p10 = scmp.lt.s32.totalorder %s2116_s15, %s2116_s15 }
  0xc2   : > { %p2119_p7 = pnand %p2117_p5, %p2421_p8  ;;  %p2126_p11 = por %p2125_p10, %p2124_p4 }
  0xc4   : > { %p2120_p9 = pneg %p2119_p7 }
  0xc6   : > { %p2127_p12 = pnand %p2126_p11, %p2120_p9 }
  0xc8   : > { %2130 = shalt.err (!%p2127_p12)
}
  0xc9   : > { %1776 = dma.hbm_to_vmem [thread:$0]  (!%p2405_p6), %s2886_s10, 512, %s453_s1, [#allocation15], %s2895_s22, %s2895_s22, %s2281_s13  }
  0xca   : > { %s2131_s19 = scalar_lea.hbm %s2887_s11, 512 }
  0xcb   : > { %p2132_p1 = scmp.ne.s32.totalorder %s2887_s11, %s2131_s19  ;;  %p2138_p0 = scmp.lt.u32.totalorder %s2131_s19, %s2887_s11 }
  0xcd   : > { %p2134_p3 = pnand %p2132_p1, %p2421_p8 }
  0xcf   : > { %p2135_p13 = pneg %p2134_p3 }
  0xd1   : > { %p2140_p2 = pnand %p2138_p0, %p2135_p13 }
  0xd3   : > { %2143 = shalt.err (!%p2140_p2)
}
  0xd4   : > { %s2144_s7 = scalar_lea.vmem %s466_s24, 512  ;;  %p2152_p4 = scmp.lt.s32.totalorder %s466_s24, %s466_s24 }
  0xd5   : > { %p2145_p5 = scmp.ne.s32.totalorder %s466_s24, %s2144_s7  ;;  %p2153_p10 = scmp.lt.s32.totalorder %s2144_s7, %s2144_s7 }
  0xd7   : > { %p2147_p7 = pnand %p2145_p5, %p2421_p8  ;;  %p2154_p11 = por %p2153_p10, %p2152_p4 }
  0xd9   : > { %p2148_p9 = pneg %p2147_p7 }
  0xdb   : > { %p2155_p12 = pnand %p2154_p11, %p2148_p9 }
  0xdd   : > { %2158 = shalt.err (!%p2155_p12)
}
  0xde   : > { %1779 = dma.hbm_to_vmem [thread:$0]  (!%p2405_p6), %s2887_s11, 512, %s466_s24, [#allocation18], %s2895_s22, %s2895_s22, %s2281_s13  }
  0xdf   : > { %s1481_s18 = sadd.s32 4294967294, %s2275_s28   ;;  %s2625_s16 = sadd.s32 1, %s2275_s28  }
  0xe0   : > { %s41_s23 = sadd.s32 1, %s2271_s27  ;;  %s38_s20 = ssub.s32 %s2275_s28, %s2625_s16 }
  0xe1   : > { %p48_p8 = scmp.ne.s32.totalorder %s2271_s27, %s2267_s26  ;;  %p39_p1 = scmp.eq.s32.totalorder %s38_s20, 0 }
  0xe2   : > { %p49_p3 = scmp.eq.s32.totalorder %s2275_s28, 0  ;;  %p54_p13 = scmp.ne.s32.totalorder %s2267_s26, %s2263_s25 }
  0xe3   : > { %p330_p0 = scmp.eq.s32.totalorder %s2389_s14, 1  ;;  %p2907_p5 = scmp.eq.s32.totalorder %s2389_s14, 0 }
  0xe4   : > { %s2637_s8 = scalar_select %p39_p1, %s2271_s27, %s41_s23  }
  0xe5   : > { %p50_p2 = por %p49_p3, %p48_p8  ;;  %p2641_p7 = por %p2907_p5, %p54_p13 }
  0xe6   : > { %p2645_p6 = por %p330_p0, %p48_p8  ;;  %p336_p9 = scmp.eq.s32.totalorder %s1481_s18, 1 }
  0xe7   : > { %p1797_p4 = scmp.lt.s32.totalorder %s2275_s28, 2  ;;  %s482_s19 = sand.u32 1, %s2271_s27  }
  0xe8   : > { %s2909_s24 = scalar_select %p2645_p6, 1, 0 }
  0xe9   : > { %p2651_p10 = por %p336_p9, %p54_p13  ;;  %s1493_s17 = sshll.u32 %s482_s19, 4 }
  0xea   : > { %s1543_s30 = sshll.u32 %s2275_s28, 8  ;;  %s486_s15 = scalar_lea.vmem [#allocation2], %s1493_s17 }
  0xeb   : > { %s2910_s21 = scalar_select %p2651_p10, 1, 0 }
  0xec   : > { %s2659_s1 = scalar_lea.hbm %s2876_s0, %s1543_s30  ;;  %s493_s23 = sshll.u32 %s486_s15, 4  ;;  %s2665_s23 = int_to_ptr.vmem [resolvable:$true] %s493_s23 }
  0xed   : > { %p2661_p11 = pnand %p1797_p4, %p50_p2  ;;  %s2667_s20 = scalar_lea.sflag [#allocation3], %s482_s19 }
  0xee   : > { %s2159_s22 = scalar_lea.hbm %s2659_s1, 256  ;;  %s2164_s12 = scalar_lea.hbm %s2876_s0, 512 }
  0xef   : > { %p2160_p12 = scmp.ne.s32.totalorder %s2659_s1, %s2159_s22  ;;  %p2161_p8 = pneg %p2661_p11 }
  0xf0   : > { %p2165_p13 = scmp.lt.u32.totalorder %s2659_s1, %s2876_s0  ;;  %p2166_p0 = scmp.lt.u32.totalorder %s2164_s12, %s2159_s22 }
  0xf1   : > { %p2162_p1 = pnand %p2161_p8, %p2160_p12  ;;  %p2168_p5 = scmp.lt.u32.totalorder %s2159_s22, %s2659_s1 }
  0xf2   : > { %p2167_p2 = por %p2166_p0, %p2165_p13 }
  0xf3   : > { %p2163_p3 = pneg %p2162_p1 }
  0xf4   : > { %p2169_p9 = por %p2168_p5, %p2167_p2 }
  0xf6   : > { %p2170_p4 = pnand %p2169_p9, %p2163_p3 }
  0xf8   : > { %2173 = shalt.err (!%p2170_p4)
}
  0xf9   : > { %s2174_s19 = scalar_lea.vmem %s2665_s23, 256  ;;  %s2288_s17 = smov [#allocation2]  }
  0xfa   : > { %p2175_p12 = scmp.ne.s32.totalorder %s2665_s23, %s2174_s19  ;;  %s2179_s30 = sshll.u32 %s2288_s17, 4  ;;  %s2180_s30 = int_to_ptr.vmem [resolvable:$false] %s2179_s30 }
  0xfb   : > { %s2181_s7 = scalar_lea.vmem %s2180_s30, 512  ;;  %p2182_p6 = scmp.lt.s32.totalorder %s2665_s23, %s2180_s30 }
  0xfc   : > { %p2177_p1 = pnand %p2175_p12, %p2161_p8  ;;  %p2183_p13 = scmp.lt.s32.totalorder %s2181_s7, %s2174_s19 }
  0xfe   : > { %p2178_p10 = pneg %p2177_p1  ;;  %p2184_p0 = por %p2183_p13, %p2182_p6 }
 0x100   : > { %p2185_p2 = pnand %p2184_p0, %p2178_p10 }
 0x102   : > { %2188 = shalt.err (!%p2185_p2)
}
 0x103   : > { %s2912_s22 = smov 128   ;;  %s2913_s12 = sld [smem:[#allocation27_spill]] }
 0x104   : > { %1783 = dma.hbm_to_vmem [thread:$0]  (!%p2661_p11), %s2659_s1, 256, %s2665_s23, %s2667_s20, %s2912_s22, %s2912_s22, %s2281_s13  }
 0x109   : > { %p2914_p8 = scmp.ne.s32.totalorder %s2913_s12, 0 }
 0x10a   : > { %s2701_s15 = sand.u32 (!%p2914_p8), 1, %s2267_s26  }
 0x10b   : > { %505 = sbr.rel (%p2914_p8) target bundleno = 1773 (0x6ed), region = 72  ;;  %s1497_s19 = sshll.u32 (!%p2914_p8), %s2701_s15, 4 }
 0x10c   : > { %s508_s17 = scalar_lea.sflag (!%p2914_p8), [#allocation3], %s2701_s15  ;;  %s511_s30 = scalar_lea.vmem (!%p2914_p8), [#allocation2], %s1497_s19 }
 0x112   : > { %2234 = dma.done.wait (%p2641_p7), %s508_s17, 256  }
 0x113   : > { %2236 = vsyncadd (%p2641_p7), %s508_s17, 4294967040  ;;  %p2915_p6 = scmp.eq.s32.totalorder %s2389_s14, 0 }
 0x115   : > { %2238 = dma.done.wait (%p2915_p6), [#allocation6], 1536   ;;  %p2916_p10 = pmov %p2915_p6 }
 0x116   : > { %p2917_p11 = pmov %p2915_p6 }
 0x117   : > { %2240 = vsyncadd (%p2916_p10), [#allocation6], 4294965760 }
 0x118   : > { %2242 = dma.done.wait (%p2917_p11), [#allocation9], 1024   ;;  %p2918_p3 = pmov %p2915_p6 }
 0x11a   : > { %2244 = vsyncadd (%p2918_p3), [#allocation9], 4294966272  ;;  %p2919_p5 = pmov %p2918_p3 }
 0x11b   : > { %p2920_p9 = pmov %p2918_p3 }
 0x11c   : > { %2246 = dma.done.wait (%p2919_p5), [#allocation12], 1024  }
 0x11d   : > { %2248 = vsyncadd (%p2920_p9), [#allocation12], 4294966272  ;;  %p2921_p7 = pmov %p2918_p3 }
 0x11e   : > { %p2922_p4 = pmov %p2918_p3 }
 0x11f   : > { %2250 = dma.done.wait (%p2921_p7), [#allocation15], 1024  }
 0x120   : > { %2252 = vsyncadd (%p2922_p4), [#allocation15], 4294966272  ;;  %p2923_p12 = pmov %p2918_p3 }
 0x121   : > { %p2924_p1 = pmov %p2918_p3 }
 0x122   : > { %2254 = dma.done.wait (%p2923_p12), [#allocation18], 512  }
 0x123   : > { %2256 = vsyncadd (%p2924_p1), [#allocation18], 4294966784  ;;  %v590_v0 = vld [vmem:[%s511_s30] sm:$0xff]  ;;  %v591_v1 = vld [vmem:[%s511_s30 + $0x8] sm:$0xff]  ;;  %s2289_s13 = smov 1   ;;  %vm620_vm0 = vcmask 392192   ;;  %v592_v14 = vlaneseq }
 0x124   : > { %v1859_v2 = vpack.i.bf16 %v591_v1, %v590_v0  ;;  %v1664_v3 = vpack.c.bf16 %v591_v1, %v590_v0  ;;  %v596_v4 = vld [vmem:[#allocation5] sm:$0xff]  ;;  %s2290_s29 = smov 127   ;;  %v2291_v6 = vmov 0   ;;  %v807_v8 = vld [vmem:[#allocation7 + $0x8] sm:$0xff]  ;;  %v809_v9 = vld [vmem:[#allocation7 + $0x18] sm:$0xff]  ;;  %vm894_vm5 = vcmask 785408  }
 0x125   : > { %1597 = vmatprep.mubr.msk.f32.mxu0 %vm620_vm0, %v596_v4  ;;  %v806_v5 = vld [vmem:[#allocation7] sm:$0xff]  ;;  %1869 = vset.pattern.permute.xlu1 %v2291_v6  ;;  %v835_v10 = vld [vmem:[#allocation8 + $0x8] sm:$0xff]  ;;  %v837_v11 = vld [vmem:[#allocation8 + $0x18] sm:$0xff]  ;;  %v593_v15 = vand.u32 127, %v592_v14  ;;  %vm2293_vm6 = vmmov 0   ;;  %s2929_s18 = sld [smem:[#allocation31_spill]] }
 0x126   : > { %1860 = vrot.lane.b32.xlu0 %v1859_v2, %s2289_s13  ;;  %v834_v7 = vld [vmem:[#allocation8] sm:$0xff]  ;;  %812 = vperm.xlu1 %1869, %v806_v5   ;;  %v808_v12 = vld [vmem:[#allocation7 + $0x10] sm:$0xff]  ;;  %v597_v26 = vld [vmem:[#allocation5 + $0x8] sm:$0xff]  ;;  %vm1063_vm7 = vcmask 261120   ;;  %vm1146_vm8 = vcmask 15360   ;;  %s2931_s20 = sld [smem:[#allocation30_spill]] }
 0x127   : > { %1870 = vset.pattern.permute.xlu0 %v2291_v6  ;;  %v836_v13 = vld [vmem:[#allocation8 + $0x10] sm:$0xff]  ;;  %vm594_vm1 = vcmp.ge.s32.totalorder %v593_v15, 1  ;;  %vm595_vm3 = vcmp.lt.s32.totalorder %v593_v15, 127  ;;  %v599_v28 = vld [vmem:[#allocation5 + $0x18] sm:$0xff]  ;;  %v992_v57 = vld [vmem:[#allocation11] sm:$0xff]  ;;  %vm1159_vm9 = vcmask 1041408  }
 0x128   : > { %vm2732_vm2 = vmpackc.low %vm594_vm1, %vm594_vm1  ;;  %v598_v27 = vld [vmem:[#allocation5 + $0x10] sm:$0xff]  ;;  %v1020_v58 = vld [vmem:[#allocation13] sm:$0xff]  ;;  %s1507_s7 = sshll.u32 %s2701_s15, 5  ;;  %s1544_s19 = sshll.u32 %s2389_s14, 9 }
 0x129   : > { %vm2740_vm4 = vmpackc.low %vm595_vm3, %vm595_vm3  ;;  %v993_v59 = vld [vmem:[#allocation11 + $0x8] sm:$0xff]  ;;  %v866_v60 = vld [vmem:[#allocation10] sm:$0xff]  ;;  %s589_s22 = scalar_lea.vmem [#allocation19], %s1507_s7  ;;  %s1309_s1 = scalar_lea.sflag [#allocation4], %s2701_s15 }
 0x12a   : > { %1865 = vrot.lane.b32.xlu0 %v1859_v2, %s2290_s29  ;;  %817 = vperm.xlu1 %1869, %v807_v8   ;;  %v994_v61 = vld [vmem:[#allocation11 + $0x10] sm:$0xff]  ;;  %v1021_v62 = vld [vmem:[#allocation13 + $0x8] sm:$0xff]  ;;  %v995_v0 = vld [vmem:[#allocation11 + $0x18] sm:$0xff]  ;;  %s1322_s12 = sshll.u32 %s589_s22, 4  ;;  %p2933_p0 = scmp.ne.s32.totalorder %s2909_s24, 0  ;;  %s2827_s12 = int_to_ptr.vmem [resolvable:$true] %s1322_s12 }
 0x12b   : > { %1633 = vmatprep.mubr.msk.f32.mxu1 %vm894_vm5, %v866_v60  ;;  %v1022_v63 = vld [vmem:[#allocation13 + $0x10] sm:$0xff]  ;;  %v1023_v1 = vld [vmem:[#allocation13 + $0x18] sm:$0xff]  ;;  %v600_v2 = vld [vmem:[#allocation5 + $0x20] sm:$0xff]  ;;  %s2189_s14 = scalar_lea.vmem %s2827_s12, 512  ;;  %s2295_s23 = smov [#allocation19]  }
 0x12c   : > { %v602_v4 = vld [vmem:[#allocation5 + $0x30] sm:$0xff]  ;;  %v603_v5 = vld [vmem:[#allocation5 + $0x38] sm:$0xff]  ;;  %v867_v19 = vld [vmem:[#allocation10 + $0x8] sm:$0xff]  ;;  %p2190_p13 = scmp.ne.s32.totalorder %s2827_s12, %s2189_s14 }
 0x12e   : > { %840 = vperm.xlu0 %1870, %v834_v7   ;;  %845 = vperm.xlu1 %1869, %v835_v10   ;;  %p2191_p2 = pnand %p2190_p13, %p2933_p0 }
 0x130   : > { %p2192_p8 = pneg %p2191_p2 }
 0x132   : > { %827 = vperm.xlu0 %1870, %v809_v9   ;;  %822 = vperm.xlu1 %1869, %v808_v12  }
 0x136   : > { %855 = vperm.xlu0 %1870, %v837_v11   ;;  %850 = vperm.xlu1 %1869, %v836_v13  }
 0x198   : > { %v1861_v16 = vpop.permute.xlu0 %1860 }
 0x199   : > { %v1863_v17 = vunpack.i.h.bf16 %v1861_v16  ;;  %v1862_v18 = vunpack.i.l.bf16 %v1861_v16 }
 0x19b   : > { %v1658_v20 = vpack.c.bf16 %v1863_v17, %v1862_v18 }
 0x19c   : > { %v1866_v21 = vpop.permute.xlu0 %1865 }
 0x19d   : > { %1660 = vmatprep.subr.msk.bf16.mxu0 %vm2732_vm2, %v1658_v20  ;;  %v1868_v22 = vunpack.i.h.bf16 %v1866_v21  ;;  %v1867_v23 = vunpack.i.l.bf16 %v1866_v21 }
 0x19e   : > { %1663 = vmatpush3.bf16.msk.msra.mxu0 %vm2732_vm2, %v1658_v20 }
 0x19f   : > { %v1668_v24 = vpack.c.bf16 %v1868_v22, %v1867_v23  ;;  %1665 = vmatprep.subr.bf16.mxu0 %v1664_v3  ;;  %v868_v23 = vld [vmem:[#allocation10 + $0x10] sm:$0xff] }
 0x1a2   : > { %1667 = vmatpush3.bf16.msra.mxu0 %v1664_v3  ;;  %v601_v3 = vld [vmem:[#allocation5 + $0x28] sm:$0xff] }
 0x1a3   : > { %1670 = vmatprep.subr.msk.bf16.mxu0 %vm2740_vm4, %v1668_v24 }
 0x1a5   : > { %v813_v29 = vpop.permute.xlu1 %812 }
 0x1a6   : > { %1673 = vmatpush3.bf16.msk.msra.mxu0 %vm2740_vm4, %v1668_v24  ;;  %v869_v24 = vld [vmem:[#allocation10 + $0x18] sm:$0xff] }
 0x1a9   : > { %1598 = vmatmul.mubr.msk.f32.vlgmr.msra.gmra.mrb[0].mxu0 %vm620_vm0, %v597_v26  ;;  %v818_v30 = vpop.permute.xlu1 %817 }
 0x1aa   : > { %1600 = vmatprep.mubr.msk.f32.mxu0 %vm620_vm0, %v598_v27 }
 0x1ad   : > { %1601 = vmatmul.mubr.msk.f32.gmra.mrb[2].mxu0 %vm620_vm0, %v599_v28  ;;  %v841_v31 = vpop.permute.xlu0 %840  ;;  %v846_v32 = vpop.permute.xlu1 %845 }
 0x1ae   : > { %1603 = vmatprep.mubr.msk.f32.mxu0 %vm620_vm0, %v600_v2 }
 0x1b1   : > { %v828_v33 = vpop.permute.xlu0 %827  ;;  %v823_v35 = vpop.permute.xlu1 %822  ;;  %1604 = vmatmul.mubr.msk.f32.gmra.mrb[4].mxu0 %vm620_vm0, %v601_v3 }
 0x1b2   : > { %1606 = vmatprep.mubr.msk.f32.mxu0 %vm620_vm0, %v602_v4 }
 0x1b5   : > { %v856_v45 = vpop.permute.xlu0 %855  ;;  %v851_v48 = vpop.permute.xlu1 %850  ;;  %1607 = vmatmul.mubr.msk.f32.gmra.mrb[6].mxu0 %vm620_vm0, %v603_v5 }
 0x27c   : > { %v1599_v34 = vpop.f32.mrb[0].mxu0 }
 0x27d   : > { %v831_v36 = vmul.f32 %v1599_v34, %v818_v30  ;;  %v711_v37 = vpop.f32.mrb[1].mxu0 }
 0x27e   : > { %v830_v38 = vmul.f32 %v813_v29, %v711_v37 }
 0x27f   : > { %v859_v39 = vadd.f32 %v846_v32, %v831_v36 }
 0x280   : > { %v858_v40 = vadd.f32 %v841_v31, %v830_v38  ;;  %v1602_v41 = vpop.f32.mrb[2].mxu0 }
 0x281   : > { %v863_v42 = vmax.f32 %v859_v39, 0.0  ;;  %v833_v43 = vmul.f32 %v1602_v41, %v828_v33  ;;  %v721_v44 = vpop.f32.mrb[3].mxu0 }
 0x282   : > { %v862_v46 = vmax.f32 %v858_v40, 0.0  ;;  %v832_v47 = vmul.f32 %v823_v35, %v721_v44 }
 0x283   : > { %v861_v49 = vadd.f32 %v856_v45, %v833_v43  ;;  %v2292_v45 = vmov 0.0|0.0  }
 0x284   : > { %v860_v50 = vadd.f32 %v851_v48, %v832_v47  ;;  %v1871_v51 = vpack.i.bf16 %v863_v42, %v862_v46  ;;  %v1686_v52 = vpack.c.bf16 %v863_v42, %v862_v46  ;;  %v751_v46 = vld [vmem:[#allocation17 + $0x8] sm:$0xff]  ;;  %v2791_v47 = vpop.f32.mrb[4].mxu0  ;;  %v752_v48 = vld [vmem:[#allocation17 + $0x10] sm:$0xff] }
 0x285   : > { %v865_v53 = vmax.f32 %v861_v49, 0.0  ;;  %v2793_v49 = vpop.f32.mrb[5].mxu0 }
 0x286   : > { %v864_v54 = vmax.f32 %v860_v50, 0.0  ;;  %1872 = vrot.lane.b32.xlu1 %v1871_v51, %s2289_s13  ;;  %v750_v50 = vld [vmem:[#allocation17] sm:$0xff] }
 0x288   : > { %v1876_v55 = vpack.i.bf16 %v865_v53, %v864_v54  ;;  %v1690_v56 = vpack.c.bf16 %v865_v53, %v864_v54  ;;  %v778_v54 = vld [vmem:[%s2929_s18] sm:$0xff] }
 0x28a   : > { %1882 = vrot.lane.b32.xlu1 %v1871_v51, %s2290_s29  ;;  %1877 = vrot.lane.b32.xlu0 %v1876_v55, %s2289_s13  ;;  %v2795_v51 = vpop.f32.mrb[6].mxu0  ;;  %s2932_s13 = sld [smem:[#allocation32_spill]] }
 0x28b   : > { %v2797_v53 = vpop.f32.mrb[7].mxu0 }
 0x28e   : > { %998 = vperm.xlu1 %1869, %v992_v57   ;;  %1887 = vrot.lane.b32.xlu0 %v1876_v55, %s2290_s29  ;;  %v753_v55 = vld [vmem:[#allocation17 + $0x18] sm:$0xff]  ;;  %v779_v57 = vld [vmem:[%s2929_s18 + $0x8] sm:$0xff]  ;;  %s2930_s29 = sld [smem:[#allocation29_spill]] }
 0x292   : > { %1026 = vperm.xlu1 %1869, %v1020_v58   ;;  %1003 = vperm.xlu0 %1870, %v993_v59   ;;  %v781_v58 = vld [vmem:[%s2929_s18 + $0x18] sm:$0xff] }
 0x294   : > { %v1061_v5 = vld [vmem:[%s2930_s29] sm:$0x3]  ;;  %s2832_s29 = scalar_lea.hbm %s2932_s13, %s1544_s19 }
 0x296   : > { %1008 = vperm.xlu1 %1869, %v994_v61   ;;  %1031 = vperm.xlu0 %1870, %v1021_v62  }
 0x29a   : > { %1036 = vperm.xlu1 %1869, %v1022_v63   ;;  %1013 = vperm.xlu0 %1870, %v995_v0  }
 0x29e   : > { %1041 = vperm.xlu0 %1870, %v1023_v1  }
 0x2f8   : > { %v1873_v6 = vpop.permute.xlu1 %1872 }
 0x2f9   : > { %v1875_v7 = vunpack.i.h.bf16 %v1873_v6  ;;  %v1874_v8 = vunpack.i.l.bf16 %v1873_v6  ;;  %v1138_v6 = vld [vmem:[#allocation14] sm:$0xff] }
 0x2fa   : > { %1652 = vmatprep.mubr.msk.f32.mxu0 %vm1146_vm8, %v1138_v6 }
 0x2fb   : > { %v1674_v9 = vpack.c.bf16 %v1875_v7, %v1874_v8  ;;  %v1062_v7 = vld [vmem:[%s2931_s20] sm:$0x3]  ;;  %s2193_s20 = sshll.u32 %s2295_s23, 4  ;;  %s2194_s20 = int_to_ptr.vmem [resolvable:$false] %s2193_s20 }
 0x2fc   : > { %v1878_v10 = vpop.permute.xlu0 %1877  ;;  %v1883_v14 = vpop.permute.xlu1 %1882  ;;  %s2195_s7 = scalar_lea.vmem %s2194_s20, 1024  ;;  %p2196_p6 = scmp.lt.s32.totalorder %s2827_s12, %s2194_s20 }
 0x2fd   : > { %v1880_v11 = vunpack.i.h.bf16 %v1878_v10  ;;  %v1879_v12 = vunpack.i.l.bf16 %v1878_v10  ;;  %1676 = vmatprep.subr.msk.bf16.mxu1 %vm2732_vm2, %v1674_v9  ;;  %v1885_v15 = vunpack.i.h.bf16 %v1883_v14  ;;  %v1884_v16 = vunpack.i.l.bf16 %v1883_v14  ;;  %v1141_v14 = vld [vmem:[#allocation14 + $0x18] sm:$0xff]  ;;  %p2197_p10 = scmp.lt.s32.totalorder %s2195_s7, %s2189_s14 }
 0x2fe   : > { %1679 = vmatpush3.bf16.msk.msra.mxu1 %vm2732_vm2, %v1674_v9 }
 0x2ff   : > { %v1680_v13 = vpack.c.bf16 %v1880_v11, %v1879_v12  ;;  %v1694_v18 = vpack.c.bf16 %v1885_v15, %v1884_v16  ;;  %v1139_v12 = vld [vmem:[#allocation14 + $0x8] sm:$0xff]  ;;  %v1142_v16 = vld [vmem:[#allocation16] sm:$0xff]  ;;  %p2198_p11 = por %p2197_p10, %p2196_p6 }
 0x300   : > { %v1888_v17 = vpop.permute.xlu0 %1887  ;;  %v1143_v15 = vld [vmem:[#allocation16 + $0x8] sm:$0xff] }
 0x301   : > { %1682 = vmatprep.subr.msk.bf16.mxu1 %vm2732_vm2, %v1680_v13  ;;  %v1890_v20 = vunpack.i.h.bf16 %v1888_v17  ;;  %v1889_v21 = vunpack.i.l.bf16 %v1888_v17  ;;  %p2199_p3 = pnand %p2198_p11, %p2192_p8 }
 0x302   : > { %1685 = vmatpush3.bf16.msk.msra.mxu1 %vm2732_vm2, %v1680_v13  ;;  %v1140_v13 = vld [vmem:[#allocation14 + $0x10] sm:$0xff] }
 0x303   : > { %1687 = vmatprep.subr.bf16.mxu1 %v1686_v52  ;;  %v1700_v22 = vpack.c.bf16 %v1890_v20, %v1889_v21 }
 0x306   : > { %1689 = vmatpush3.bf16.msra.mxu1 %v1686_v52  ;;  %v2294_v52 = vmov 0.0  }
 0x307   : > { %1691 = vmatprep.subr.bf16.mxu1 %v1690_v56 }
 0x30a   : > { %1693 = vmatpush3.bf16.msra.mxu1 %v1690_v56  ;;  %v780_v56 = vld [vmem:[%s2929_s18 + $0x10] sm:$0xff] }
 0x30b   : > { %1696 = vmatprep.subr.msk.bf16.mxu1 %vm2740_vm4, %v1694_v18 }
 0x30d   : > { %v999_v27 = vpop.permute.xlu1 %998 }
 0x30e   : > { %1699 = vmatpush3.bf16.msk.msra.mxu1 %vm2740_vm4, %v1694_v18 }
 0x30f   : > { %1702 = vmatprep.subr.msk.bf16.mxu1 %vm2740_vm4, %v1700_v22 }
 0x311   : > { %v1004_v26 = vpop.permute.xlu0 %1003  ;;  %v1027_v29 = vpop.permute.xlu1 %1026 }
 0x312   : > { %1705 = vmatpush3.bf16.msk.msra.mxu1 %vm2740_vm4, %v1700_v22  ;;  %v1145_v22 = vld [vmem:[#allocation16 + $0x18] sm:$0xff] }
 0x313   : > { %1706 = vmatprep.subr.bf16.mxu1 %v2292_v45 }
 0x315   : > { %1634 = vmatmul.mubr.msk.f32.vlgmr.msra.gmra.mrb[0].mxu1 %vm894_vm5, %v867_v19  ;;  %v1032_v28 = vpop.permute.xlu0 %1031  ;;  %v1009_v32 = vpop.permute.xlu1 %1008 }
 0x316   : > { %1636 = vmatprep.mubr.msk.f32.mxu1 %vm894_vm5, %v868_v23  ;;  %v1144_v23 = vld [vmem:[#allocation16 + $0x10] sm:$0xff] }
 0x319   : > { %1637 = vmatmul.mubr.msk.f32.gmra.mrb[2].mxu1 %vm894_vm5, %v869_v24  ;;  %v1014_v30 = vpop.permute.xlu0 %1013  ;;  %v1037_v42 = vpop.permute.xlu1 %1036 }
 0x31a   : > { %1647 = vmatprep.mubr.msk.f32.mxu1 %vm2293_vm6, %v2294_v52 }
 0x31d   : > { %v1042_v40 = vpop.permute.xlu0 %1041 }
 0x3e8   : > { %v1635_v31 = vpop.f32.mrb[0].mxu1 }
 0x3e9   : > { %v1017_v33 = vmul.f32 %v1635_v31, %v1004_v26  ;;  %v973_v34 = vpop.f32.mrb[1].mxu1 }
 0x3ea   : > { %v1016_v25 = vmul.f32 %v999_v27, %v973_v34 }
 0x3eb   : > { %v2779_v35 = vadd.f32 %v1032_v28, %v1017_v33 }
 0x3ec   : > { %v1638_v36 = vpop.f32.mrb[2].mxu1  ;;  %v2781_v37 = vadd.f32 %v1027_v29, %v1016_v25 }
 0x3ed   : > { %v1019_v38 = vmul.f32 %v1638_v36, %v1014_v30  ;;  %1050 = vadd.xlane.f32.xlu0 %v2779_v35  ;;  %v983_v39 = vpop.f32.mrb[3].mxu1 }
 0x3ee   : > { %v1018_v41 = vmul.f32 %v1009_v32, %v983_v39  ;;  %1048 = vadd.xlane.f32.xlu1 %v2781_v37 }
 0x3ef   : > { %v2785_v43 = vadd.f32 %v1042_v40, %v1019_v38 }
 0x3f0   : > { %v2787_v44 = vadd.f32 %v1037_v42, %v1018_v41 }
 0x3f2   : > { %1054 = vadd.xlane.f32.xlu1 %v2785_v43  ;;  %1052 = vadd.xlane.f32.xlu0 %v2787_v44 }
 0x403   : > { %761 = vperm.xlu1 %1869, %v751_v46  }
 0x407   : > { %766 = vperm.xlu1 %1869, %v752_v48  }
 0x408   : > { %756 = vperm.xlu0 %1870, %v750_v50  }
 0x40b   : > { %784 = vperm.xlu1 %1869, %v778_v54  }
 0x40c   : > { %771 = vperm.xlu0 %1870, %v753_v55  }
 0x40f   : > { %794 = vperm.xlu1 %1869, %v780_v56  }
 0x410   : > { %789 = vperm.xlu0 %1870, %v779_v57  }
 0x414   : > { %799 = vperm.xlu0 %1870, %v781_v58  }
 0x47a   : > { %v1051_v59 = vpop.xlane.xlu0 %1050 }
 0x47b   : > { %v1058_v60 = vmul.f32 0.0078125, %v1051_v59  ;;  %v1049_v61 = vpop.xlane.xlu1 %1048 }
 0x47c   : > { %v1057_v62 = vmul.f32 0.0078125, %v1049_v61 }
 0x47e   : > { %v1707_v63 = vpack.c.bf16 %v1058_v60, %v1057_v62 }
 0x47f   : > { %v1055_v0 = vpop.xlane.xlu1 %1054  ;;  %v1053_v1 = vpop.xlane.xlu0 %1052 }
 0x480   : > { %v1060_v2 = vmul.f32 0.0078125, %v1055_v0  ;;  %v1059_v3 = vmul.f32 0.0078125, %v1053_v1  ;;  %1708 = vmatpush3.bf16.msra.mxu1 %v1707_v63 }
 0x481   : > { %1709 = vmatprep.subr.bf16.mxu1 %v2292_v45 }
 0x482   : > { %v1710_v4 = vpack.c.bf16 %v1060_v2, %v1059_v3 }
 0x483   : > { %v762_v56 = vpop.permute.xlu1 %761 }
 0x484   : > { %1711 = vmatpush3.bf16.msra.mxu1 %v1710_v4  ;;  %v775_v63 = vmul.f32 %v2791_v47, %v762_v56 }
 0x487   : > { %1648 = vmatmul.mubr.msk.f32.vlgmr.msra.gmra.mrb[4].mxu1 %vm1063_vm7, %v1061_v5  ;;  %v757_v55 = vpop.permute.xlu0 %756  ;;  %v767_v58 = vpop.permute.xlu1 %766 }
 0x488   : > { %v774_v0 = vmul.f32 %v757_v55, %v2793_v49 }
 0x48b   : > { %v772_v57 = vpop.permute.xlu0 %771  ;;  %v785_v60 = vpop.permute.xlu1 %784 }
 0x48c   : > { %v802_v5 = vadd.f32 %v785_v60, %v774_v0 }
 0x48f   : > { %v790_v59 = vpop.permute.xlu0 %789  ;;  %v795_v62 = vpop.permute.xlu1 %794 }
 0x490   : > { %v803_v2 = vadd.f32 %v790_v59, %v775_v63 }
 0x493   : > { %v800_v61 = vpop.permute.xlu0 %799 }
 0x55a   : > { %v1133_v8 = vpop.f32.mrb[4].mxu1 }
 0x55b   : > { %v1134_v9 = vadd.f32 %v1133_v8, %v1062_v7  ;;  %v1649_v10 = vpop.f32.mrb[5].mxu1  ;;  %v777_v7 = vmul.f32 %v2795_v51, %v772_v57 }
 0x55d   : > { %v1137_v11 = vmax.f32 %v1134_v9, 0.0  ;;  %v776_v9 = vmul.f32 %v767_v58, %v2797_v53  ;;  %v805_v47 = vadd.f32 %v800_v61, %v777_v7 }
 0x55f   : > { %1650 = vmatprep.subr.msk.mxu0 %vm1159_vm9, %v1137_v11 }
 0x560   : > { %1651 = vmatpush3.msk.msra.mxu0 %vm1159_vm9, %v1137_v11 }
 0x561   : > { %1653 = vmatmul.mubr.msk.f32.vlgmr.msra.gmra.mrb[8].mxu0 %vm1146_vm8, %v1139_v12 }
 0x562   : > { %1655 = vmatprep.mubr.msk.f32.mxu0 %vm1146_vm8, %v1140_v13  ;;  %v804_v13 = vadd.f32 %v795_v62, %v776_v9 }
 0x565   : > { %1656 = vmatmul.mubr.msk.f32.gmra.mrb[10].mxu0 %vm1146_vm8, %v1141_v14 }
 0x634   : > { %v1654_v17 = vpop.f32.mrb[8].mxu0 }
 0x635   : > { %v1235_v18 = vadd.f32 %v1654_v17, %v1143_v15  ;;  %v1229_v20 = vpop.f32.mrb[9].mxu0 }
 0x636   : > { %v1230_v21 = vadd.f32 %v1229_v20, %v1142_v16 }
 0x637   : > { %v1249_v19 = vsub.f32 0.0, %v1235_v18 }
 0x638   : > { %v1248_v24 = vsub.f32 0.0, %v1230_v21  ;;  %v1657_v26 = vpop.f32.mrb[10].mxu0 }
 0x639   : > { %v1254_v27 = vmul.f32 1.442695, %v1249_v19  ;;  %v1245_v28 = vadd.f32 %v1657_v26, %v1145_v22  ;;  %v1239_v29 = vpop.f32.mrb[11].mxu0 }
 0x63a   : > { %v1252_v30 = vmul.f32 1.442695, %v1248_v24  ;;  %v1240_v31 = vadd.f32 %v1239_v29, %v1144_v23 }
 0x63b   : > { %1891 = vpow2.f32 %v1254_v27  ;;  %v1251_v32 = vsub.f32 0.0, %v1245_v28 }
 0x63c   : > { %1893 = vpow2.f32 %v1252_v30  ;;  %v1250_v33 = vsub.f32 0.0, %v1240_v31 }
 0x63d   : > { %v1258_v34 = vmul.f32 1.442695, %v1251_v32 }
 0x63e   : > { %v1256_v25 = vmul.f32 1.442695, %v1250_v33 }
 0x63f   : > { %1895 = vpow2.f32 %v1258_v34 }
 0x640   : > { %1897 = vpow2.f32 %v1256_v25 }
 0x645   : > { %v1892_v36 = vpop.eup %1891 }
 0x646   : > { %v1894_v38 = vpop.eup %1893  ;;  %v1261_v39 = vadd.f32 1.0, %v1892_v36 }
 0x647   : > { %v1260_v40 = vadd.f32 1.0, %v1894_v38 }
 0x648   : > { %1899 = vrcp.f32 %v1261_v39 }
 0x649   : > { %v1896_v41 = vpop.eup %1895  ;;  %1901 = vrcp.f32 %v1260_v40 }
 0x64a   : > { %v1898_v42 = vpop.eup %1897  ;;  %v1263_v45 = vadd.f32 1.0, %v1896_v41 }
 0x64b   : > { %v1262_v46 = vadd.f32 1.0, %v1898_v42 }
 0x64c   : > { %1903 = vrcp.f32 %v1263_v45 }
 0x64d   : > { %1905 = vrcp.f32 %v1262_v46 }
 0x652   : > { %v1900_v48 = vpop.eup %1899 }
 0x653   : > { %v1902_v50 = vpop.eup %1901  ;;  %1279 = vperm.xlu0 %1870, %v1900_v48  }
 0x654   : > { %1274 = vperm.xlu1 %1869, %v1902_v50  }
 0x656   : > { %v1904_v52 = vpop.eup %1903 }
 0x657   : > { %v1906_v54 = vpop.eup %1905  ;;  %1289 = vperm.xlu0 %1870, %v1904_v52  }
 0x658   : > { %1284 = vperm.xlu1 %1869, %v1906_v54  }
 0x6d2   : > { %v1280_v1 = vpop.permute.xlu0 %1279 }
 0x6d3   : > { %v1293_v3 = vmul.f32 %v1280_v1, %v2779_v35  ;;  %v1275_v4 = vpop.permute.xlu1 %1274 }
 0x6d4   : > { %v1292_v6 = vmul.f32 %v1275_v4, %v2781_v37 }
 0x6d5   : > { %v1297_v8 = vadd.f32 %v1293_v3, %v803_v2 }
 0x6d6   : > { %v1296_v10 = vadd.f32 %v1292_v6, %v802_v5  ;;  %v1290_v11 = vpop.permute.xlu0 %1289 }
 0x6d7   : > { %v1301_v49 = vmax.f32 %v1297_v8, 0.0  ;;  %v1295_v12 = vmul.f32 %v1290_v11, %v2785_v43  ;;  %v1285_v35 = vpop.permute.xlu1 %1284 }
 0x6d8   : > { %v1300_v14 = vmax.f32 %v1296_v10, 0.0  ;;  %v1294_v37 = vmul.f32 %v1285_v35, %v2787_v44 }
 0x6d9   : > { %1305 = vst [vmem:[%s589_s22 + $0x8] sm:$0xff] %v1301_v49  ;;  %v1299_v51 = vadd.f32 %v1295_v12, %v805_v47 }
 0x6da   : > { %1304 = vst [vmem:[%s589_s22] sm:$0xff] %v1300_v14  ;;  %v1298_v53 = vadd.f32 %v1294_v37, %v804_v13 }
 0x6db   : > { %v1303_v15 = vmax.f32 %v1299_v51, 0.0 }
 0x6dc   : > { %v1302_v43 = vmax.f32 %v1298_v53, 0.0 }
 0x6dd   : > { %1307 = vst [vmem:[%s589_s22 + $0x18] sm:$0xff] %v1303_v15 }
 0x6de   : > { %1306 = vst [vmem:[%s589_s22 + $0x10] sm:$0xff] %v1302_v43 }
 0x6df   : > { %2202 = shalt.err (!%p2199_p3)
}
 0x6e0   : > { %s2203_s22 = scalar_lea.hbm %s2832_s29, 512  ;;  %s2207_s30 = scalar_lea.hbm %s2932_s13, 1024 }
 0x6e1   : > { %p2204_p5 = scmp.ne.s32.totalorder %s2832_s29, %s2203_s22  ;;  %p2208_p4 = scmp.lt.u32.totalorder %s2832_s29, %s2932_s13 }
 0x6e2   : > { %p2209_p12 = scmp.lt.u32.totalorder %s2207_s30, %s2203_s22  ;;  %p2211_p13 = scmp.lt.u32.totalorder %s2203_s22, %s2832_s29 }
 0x6e3   : > { %p2205_p9 = pnand %p2204_p5, %p2933_p0 }
 0x6e4   : > { %p2210_p1 = por %p2209_p12, %p2208_p4 }
 0x6e5   : > { %p2206_p7 = pneg %p2205_p9 }
 0x6e6   : > { %p2212_p2 = por %p2211_p13, %p2210_p1 }
 0x6e8   : > { %p2213_p8 = pnand %p2212_p2, %p2206_p7 }
 0x6ea   : > { %2216 = shalt.err (!%p2213_p8)
}
 0x6eb   : > { %s2296_s14 = smov 128   ;;  %s2297_s7 = smov 8  }
 0x6ec   : > { %1750 = dma.vmem_to_hbm [thread:$0]  (%p2933_p0), %s2827_s12, 512, %s2832_s29, %s1309_s1, %s2296_s14, %s2296_s14, %s2297_s7  }
 0x6ed PF: > { %s1337_s19 = sand.u32 1, %s2263_s25   ;;  %p2934_p6 = scmp.ne.s32.totalorder %s2910_s21, 0 }
 0x6ee   : > { %p2935_p10 = scmp.ge.s32.totalorder %s2275_s28, 2  ;;  %s1338_s22 = scalar_lea.sflag [#allocation4], %s1337_s19 }
 0x6f0   : > { %p1785_p11 = pnand %p2935_p10, %p2934_p6 }
 0x6f2   : > { %2258 = dma.done.wait (!%p1785_p11), %s1338_s22, 512  }
 0x6f3   : > { %2260 = vsyncadd (!%p1785_p11), %s1338_s22, 4294966784  ;;  %p31_p3 = scmp.ge.s32.totalorder %s2625_s16, 4   ;;  %s2936_s25 = smov %s2267_s26 }
 0x6f4   : > { %s2937_s26 = smov %s2271_s27  ;;  %s2938_s27 = smov %s2637_s8 }
 0x6f5   : > { %s2939_s28 = smov %s2625_s16  ;;  %33 = sbr.rel (!%p31_p3) target bundleno = 16 (0x10), region = 153 }
 0x6fc   :  { %1343 = vsyncpa [#allocation3], 1 }
 0x6fd   :  { %1345 = vsyncpa [#allocation3 + $0x1], 1 }
 0x6fe   :  { %1346 = vsyncpa [#allocation6], 1 }
 0x6ff   :  { %1347 = vsyncpa [#allocation9], 1 }
 0x700   :  { %1348 = vsyncpa [#allocation12], 1 }
 0x701   :  { %1349 = vsyncpa [#allocation15], 1 }
 0x702   :  { %1350 = vsyncpa [#allocation18], 1 }
 0x703   :  { %1351 = vsyncpa [#allocation4], 1 }
 0x704   :  { %1353 = vsyncpa [#allocation4 + $0x1], 1 }

</bundles_post_ra>
